<compile_context>
chip_gen: v7x
topology: tpu7x:2x2x1
jax: 0.10.0
libtpu: 0.0.40
codegen_flags: <defaults>
</compile_context>

<pallas_src>
import functools

import numpy as np

import jax
import jax.numpy as jnp
from jax import lax
from jax.experimental import pallas as pl
from jax.experimental.pallas import tpu as pltpu


def _cdiv(a, b):
    return -(-a // b)


def _round_up(a, b):
    return _cdiv(a, b) * b


# ---------------------------------------------------------------------------
# Pallas kernel: one tile of `roi_tile` rois per grid step == ONE MXU matmul.
# ---------------------------------------------------------------------------
def _align_pool_kernel(tile_batch_ref, a_ref, xw_ref, bias_ref, o_ref):
    """tile_batch_ref: (n_tiles,) int32 SMEM  per-tile batch id (used by the index_maps)
       a_ref   : (roi_tile, s_tot*T) bf16     ROI-Align interp weights, (bin, time) on lanes
       xw_ref  : (1, s_tot*T, C)     bf16     conv-folded features of this tile's batch
       bias_ref: (1, C)              f32      concatenated Conv3d biases
       o_ref   : (roi_tile, C)       f32      output tile (lane-dense for production C>=128)
    """
    del tile_batch_ref  # consumed by the index_maps only
    # ROI-Align pooling AND the per-scale Conv3d contraction fused into a single
    # bf16 MXU matmul with f32 accumulation (K = s_tot*T, N = C).
    acc = jnp.dot(a_ref[...], xw_ref[0], preferred_element_type=jnp.float32)
    o_ref[...] = acc + bias_ref[...]


# ---------------------------------------------------------------------------
# Wrapper helpers (plain XLA: roi-coordinate scalar math + layout glue).
# ---------------------------------------------------------------------------
def _roi_interp_matrix(rois, seq_len, resolution):
    """1-D ROI-Align interpolation weights A[n, i, t] such that
       pooled[n, c, i] = sum_t A[n, i, t] * feature[batch(n), c, t].
       Mirrors the Align1D CUDA kernel (spatial_scale=1, adaptive sampling).
       Built with a scatter-add over the two touched time indices per sample
       (no width-T one-hots); samples per bin capped at ceil(T/res)."""
    n = rois.shape[0]
    max_samples = _cdiv(seq_len, resolution)          # bound on ceil(len/res), len <= T
    start = rois[:, 1].astype(jnp.float32)
    end = rois[:, 2].astype(jnp.float32)
    length = jnp.maximum(end - start, 1.0)                          # (N,)
    bin_size = length / resolution
    n_samples = jnp.maximum(jnp.ceil(length / resolution), 1.0)     # adaptive ratio
    i = jnp.arange(resolution, dtype=jnp.float32)[None, :, None]    # (1, R, 1)
    iy = jnp.arange(max_samples, dtype=jnp.float32)[None, None, :]  # (1, 1, S)
    bs = bin_size[:, None, None]
    cnt = n_samples[:, None, None]
    y = start[:, None, None] + i * bs + (iy + 0.5) * bs / cnt       # (N, R, S)
    valid = (iy < cnt) & (y >= -1.0) & (y <= seq_len)
    yc = jnp.maximum(y, 0.0)
    y_low0 = jnp.floor(yc)
    at_top = y_low0 >= seq_len - 1
    y_low = jnp.where(at_top, seq_len - 1.0, y_low0).astype(jnp.int32)
    y_high = jnp.where(at_top, seq_len - 1.0, y_low0 + 1.0).astype(jnp.int32)
    ly = jnp.where(at_top, 0.0, yc - y_low0)
    hy = 1.0 - ly
    w = jnp.where(valid, 1.0, 0.0) / cnt                            # (N, R, S)

    shape = (n, resolution, max_samples)
    n_idx = lax.broadcasted_iota(jnp.int32, shape, 0)
    r_idx = lax.broadcasted_iota(jnp.int32, shape, 1)
    a = jnp.zeros((n, resolution, seq_len), jnp.float32)
    a = a.at[n_idx, r_idx, jnp.broadcast_to(y_low, shape)].add(
        jnp.broadcast_to(w * hy, shape))
    a = a.at[n_idx, r_idx, jnp.broadcast_to(y_high, shape)].add(
        jnp.broadcast_to(w * ly, shape))
    return a                                                        # (N, R, T)


@functools.partial(jax.jit, static_argnames=("multi_scale", "roi_tile"))
def align_pool_multi_avr(input_vectors, rois, conv_weights, conv_biases,
                         *, multi_scale=(1, 3, 7, 9), roi_tile=None):
    """JAX/Pallas equivalent of Align_pool_mutil_avr.forward.

    input_vectors : (B, C, T) float32   (C == input_dim, T == max_len)
    rois          : (N, 3)  float32     columns (batch_idx, start, end)
    conv_weights  : tuple of (C//hec, C//hec, scale_j) Conv3d weights (k=(s,1,1))
    conv_biases   : tuple of (C//hec,) Conv3d biases
    returns       : (N, C) float32
    """
    B, C, T = input_vectors.shape
    hec = len(multi_scale)
    assert C % hec == 0, "input_dim must be divisible by len(multi_scale)"
    ch = C // hec
    n_rois = rois.shape[0]
    s_tot = int(sum(multi_scale))
    k_dim = s_tot * T

    if roi_tile is None:
        # Fill MXU rows (up to 256) but keep >= 2 roi tiles so the single
        # "parallel" grid axis can shard across both v7x TensorCores; multiple
        # of 16 for bf16 sublane packing.
        roi_tile = min(256, max(16, _round_up(_cdiv(n_rois, 2), 16)))
    assert roi_tile % 16 == 0, "roi_tile must be a multiple of 16 (bf16 sublanes)"

    # Static worst-case tile count for per-batch bucketing:
    #   sum_b ceil(count_b / roi_tile) <= ceil(N / roi_tile) + (B - 1)
    n_tiles = _cdiv(n_rois, roi_tile) + (B - 1)
    n_pad = n_tiles * roi_tile

    # rois[:, 2] -= 1, applied functionally (JAX arrays are immutable, so unlike
    # the PyTorch module the caller's array is not mutated).
    rois_adj = rois.at[:, 2].add(-1.0)

    # --- ROI-Align interpolation weights, all scales concatenated over bins ----
    a_cat = jnp.concatenate(
        [_roi_interp_matrix(rois_adj, T, int(r)) for r in multi_scale], axis=1)
    a_rows = a_cat.reshape(n_rois, k_dim)                           # (N, s_tot*T)

    # --- bucket rois by batch so every grid tile reads ONE batch's features ----
    batch_idx = rois_adj[:, 0].astype(jnp.int32)
    order = jnp.argsort(batch_idx)                                  # stable
    sorted_batch = batch_idx[order]
    counts = jnp.bincount(batch_idx, length=B).astype(jnp.int32)    # (B,)
    tiles_per_batch = (counts + roi_tile - 1) // roi_tile
    tile_end = jnp.cumsum(tiles_per_batch).astype(jnp.int32)        # (B,)
    tile_start = jnp.concatenate([jnp.zeros((1,), jnp.int32), tile_end])[:B]
    slot_start = tile_start * roi_tile                              # row offset per group
    group_start = jnp.concatenate(
        [jnp.zeros((1,), jnp.int32), jnp.cumsum(counts).astype(jnp.int32)])[:B]
    pos = jnp.arange(n_rois, dtype=jnp.int32) - group_start[sorted_batch]
    slot = (slot_start[sorted_batch] + pos).astype(jnp.int32)       # dest row of sorted roi

    # Streamed operand A: bf16, (roi_tile, s_tot*T) rows per tile, no batch fold.
    a_pad = jnp.zeros((n_pad, k_dim), jnp.bfloat16).at[slot].set(
        a_rows[order].astype(jnp.bfloat16))

    # Per-tile batch id for the scalar-prefetch index_map (padding tiles clamp to B-1;
    # their outputs are never gathered back).
    tile_batch = jnp.minimum(
        jnp.searchsorted(tile_end, jnp.arange(n_tiles, dtype=jnp.int32), side="right"),
        B - 1).astype(jnp.int32)

    # --- fold the grouped Conv3d into the feature operand (once per call) ------
    # X'[b, s*T + t, c_out] = sum_c x[b, c, t] * W_fold[s, c, c_out]
    xw = jnp.zeros((B, s_tot, T, C), jnp.float32)
    off = 0
    for j, res in enumerate(multi_scale):
        xg = input_vectors[:, j * ch:(j + 1) * ch, :].astype(jnp.float32)  # (B, ch, T)
        wj = conv_weights[j].astype(jnp.float32)                           # (o, c, res)
        blk = jnp.einsum("bct,oci->bito", xg, wj)                          # (B, res, T, ch)
        xw = xw.at[:, off:off + res, :, j * ch:(j + 1) * ch].set(blk)
        off += res
    xw = xw.reshape(B, k_dim, C).astype(jnp.bfloat16)

    bias = jnp.concatenate([conv_biases[j].astype(jnp.float32)
                            for j in range(hec)]).reshape(1, C)

    # --- VMEM budget + advisory cost estimate ----------------------------------
    a_tile_bytes = roi_tile * k_dim * 2
    xw_tile_bytes = k_dim * C * 2
    out_tile_bytes = roi_tile * C * 4
    vmem_limit = int(min(64 * 2**20,
                         max(32 * 2**20,
                             2 * (a_tile_bytes + xw_tile_bytes + out_tile_bytes)
                             + (1 << 20))))
    cost = pl.CostEstimate(
        flops=2 * n_pad * k_dim * C,
        transcendentals=0,
        bytes_accessed=n_pad * k_dim * 2 + B * k_dim * C * 2 + n_pad * C * 4 + C * 4)

    out_pad = pl.pallas_call(
        _align_pool_kernel,
        out_shape=jax.ShapeDtypeStruct((n_pad, C), jnp.float32),
        grid_spec=pltpu.PrefetchScalarGridSpec(
            num_scalar_prefetch=1,
            grid=(n_tiles,),
            in_specs=[
                # streamed A tile (at production shapes: pipeline_mode=pl.Buffered(3)
                # here if its DMA is still exposed)
                pl.BlockSpec((roi_tile, k_dim), lambda g, tb: (g, 0)),
                # conv-folded features of this tile's batch (grid-quasi-invariant;
                # at production shapes single-buffer with pipeline_mode=pl.Buffered(1))
                pl.BlockSpec((1, k_dim, C), lambda g, tb: (tb[g], 0, 0)),
                # concatenated Conv3d biases (grid-invariant)
                pl.BlockSpec((1, C), lambda g, tb: (0, 0)),
            ],
            out_specs=pl.BlockSpec((roi_tile, C), lambda g, tb: (g, 0)),
        ),
        compiler_params=pltpu.CompilerParams(
            dimension_semantics=("parallel",),
            vmem_limit_bytes=vmem_limit),
        cost_estimate=cost,
    )(tile_batch, a_pad, xw, bias)

    # Un-bucket back to the caller's roi order (padding rows are never touched).
    roi_slot = jnp.zeros((n_rois,), jnp.int32).at[order].set(slot)
    return out_pad[roi_slot]


# ---------------------------------------------------------------------------
# Pure-numpy reference mirroring the PyTorch module (loops over rois/bins/samples).
# ---------------------------------------------------------------------------
def _reference(x_in, rois_in, conv_ws, conv_bs, multi_scale):
    x = np.asarray(x_in, dtype=np.float32)
    rois = np.array(np.asarray(rois_in, dtype=np.float32), copy=True)
    B, C, T = x.shape
    hec = len(multi_scale)
    ch = C // hec
    rois[:, 2] = rois[:, 2] - 1.0
    n = rois.shape[0]
    outs = []
    for j, res in enumerate(multi_scale):
        sub = x[:, j * ch:(j + 1) * ch, :]                        # (B, ch, T)
        pooled = np.zeros((n, ch, res), dtype=np.float32)
        for r in range(n):
            b = int(rois[r, 0])
            s0 = np.float32(rois[r, 1])
            s1 = np.float32(rois[r, 2])
            length = np.float32(max(s1 - s0, np.float32(1.0)))
            bs = np.float32(length / np.float32(res))
            grid = max(int(np.ceil(length / np.float32(res))), 1)
            for i in range(res):
                acc = np.zeros((ch,), dtype=np.float32)
                for iy in range(grid):
                    y = np.float32(s0 + np.float32(i) * bs
                                   + (np.float32(iy) + np.float32(0.5)) * bs
                                   / np.float32(grid))
                    if y < -1.0 or y > T:
                        continue
                    y = max(y, np.float32(0.0))
                    yl = int(np.floor(y))
                    if yl >= T - 1:
                        yl = yh = T - 1
                        ly = np.float32(0.0)
                    else:
                        yh = yl + 1
                        ly = np.float32(y - np.float32(yl))
                    hy = np.float32(1.0) - ly
                    acc = acc + hy * sub[b, :, yl] + ly * sub[b, :, yh]
                pooled[r, :, i] = acc / np.float32(grid)
        w = np.asarray(conv_ws[j], dtype=np.float32)              # (ch_out, ch_in, res)
        bconv = np.asarray(conv_bs[j], dtype=np.float32)
        out_j = np.einsum('ncr,ocr->no', pooled, w) + bconv[None, :]
        outs.append(out_j.astype(np.float32))
    return np.concatenate(outs, axis=1)                           # (N, C)


if __name__ == "__main__":
    # Small shapes: batch=2, input_dim=32 (4 groups of 8 channels), seq len=16,
    # 16 rois -> roi_tile=16, grid of 2 roi tiles (one per batch bucket).
    B, C, T = 2, 32, 16
    multi_scale = (1, 3, 7, 9)
    hec = len(multi_scale)
    ch = C // hec
    n_rois = 16

    key0 = jax.random.PRNGKey(0)
    k_feat, k_b, k_s, k_l, *k_w = jax.random.split(key0, 4 + 2 * hec)

    x = jax.random.normal(k_feat, (B, C, T), dtype=jnp.float32)

    # rois: (batch_idx, start, end) with quarter-unit coordinates (keeps the
    # float32 ceil/floor decisions of the kernel path and the reference aligned).
    batch_idx = jax.random.randint(k_b, (n_rois,), 0, B).astype(jnp.float32)
    start = jnp.round(jax.random.uniform(k_s, (n_rois,), minval=0.0,
                                         maxval=T / 2) * 4.0) / 4.0
    length = jnp.round(jax.random.uniform(k_l, (n_rois,), minval=1.0,
                                          maxval=T / 2) * 4.0) / 4.0
    end = jnp.minimum(start + length, float(T - 1))
    rois = jnp.stack([batch_idx, start, end], axis=1)

    conv_ws = tuple(jax.random.normal(k_w[2 * j], (ch, ch, r), dtype=jnp.float32) * 0.2
                    for j, r in enumerate(multi_scale))
    conv_bs = tuple(jax.random.normal(k_w[2 * j + 1], (ch,), dtype=jnp.float32) * 0.2
                    for j in range(hec))

    out = align_pool_multi_avr(x, rois, conv_ws, conv_bs, multi_scale=multi_scale)
    jax.block_until_ready(out)

    ref = _reference(x, rois, conv_ws, conv_bs, multi_scale)
    assert out.shape == (n_rois, C), out.shape
    out_np = np.asarray(out, dtype=np.float32)
    err = np.max(np.abs(out_np - ref))
    # bf16 MXU operands with f32 accumulation -> ~1e-2 level error vs the f32 reference.
    assert np.allclose(out_np, ref, atol=1e-1, rtol=1e-1), f"max abs err {err}"

    print("KERNEL_OK")
</pallas_src>

<mosaic_0001>
module attributes {stable_mosaic.version = 11 : i64} {
  func.func private @main(%arg0: i32) attributes {dimension_semantics = [#tpu.dimension_semantics<core_parallel>], iteration_bounds = array<i64: 2>, tpu.core_type = #tpu.core_type<sc_scalar_subcore>, window_params = []} {
    return
  }
}

module attributes {stable_mosaic.version = 11 : i64} {
  func.func private @main(%arg0: i32) attributes {dimension_semantics = [#tpu.dimension_semantics<core_parallel>], iteration_bounds = array<i64: 2>, tpu.core_type = #tpu.core_type<sc_scalar_subcore>, window_params = []} {
    return
  }
}

module attributes {stable_mosaic.version = 11 : i64} {
  func.func @_align_pool_kernel(%arg0: i32, %arg1: memref<2xi32, #tpu.memory_space<smem>>, %arg2: memref<16x320xbf16, #tpu.memory_space<vmem>>, %arg3: memref<1x320x32xbf16, #tpu.memory_space<vmem>>, %arg4: memref<1x32xf32, #tpu.memory_space<vmem>>, %arg5: memref<16x32xf32, #tpu.memory_space<vmem>>) attributes {dimension_semantics = [#tpu.dimension_semantics<parallel>], iteration_bounds = array<i64: 2>, scalar_prefetch = 1 : i64, scratch_operands = 0 : i64, tpu.core_type = #tpu.core_type<tc>, window_params = [{transform_indices = @transform_0, window_bounds = array<i64: 16, 320>}, {transform_indices = @transform_1, window_bounds = array<i64: 1, 320, 32>}, {pipeline_mode = #tpu.pipeline_mode<synchronous>, transform_indices = @transform_2, window_bounds = array<i64: 1, 32>}, {transform_indices = @transform_3, window_bounds = array<i64: 16, 32>}]} {
    %c0 = arith.constant 0 : index
    %c0_0 = arith.constant 0 : index
    %0 = vector.load %arg2[%c0, %c0_0] : memref<16x320xbf16, #tpu.memory_space<vmem>>, vector<16x320xbf16>
    %c0_1 = arith.constant 0 : index
    %c0_2 = arith.constant 0 : index
    %c0_3 = arith.constant 0 : index
    %1 = vector.load %arg3[%c0_1, %c0_2, %c0_3] : memref<1x320x32xbf16, #tpu.memory_space<vmem>>, vector<1x320x32xbf16>
    %2 = vector.shape_cast %1 : vector<1x320x32xbf16> to vector<320x32xbf16>
    %cst = arith.constant dense<0.000000e+00> : vector<16x32xf32>
    %3 = tpu.matmul %0, %2, %cst {dimension_numbers = #tpu.dot_dimension_numbers<[1], [0], [0], [1], [0, 0, 1, 1], [], []>} : vector<16x320xbf16>, vector<320x32xbf16>, vector<16x32xf32> -> vector<16x32xf32>
    %c0_4 = arith.constant 0 : index
    %c0_5 = arith.constant 0 : index
    %4 = vector.load %arg4[%c0_4, %c0_5] : memref<1x32xf32, #tpu.memory_space<vmem>>, vector<1x32xf32>
    %5 = vector.broadcast %4 : vector<1x32xf32> to vector<16x32xf32>
    %6 = arith.addf %3, %5 : vector<16x32xf32>
    %c0_6 = arith.constant 0 : index
    %c0_7 = arith.constant 0 : index
    %7 = vector.load %arg5[%c0_6, %c0_7] : memref<16x32xf32, #tpu.memory_space<vmem>>, vector<16x32xf32>
    tpu.vector_store %arg5[%c0_6, %c0_7], %6 {strides = array<i32>} : memref<16x32xf32, #tpu.memory_space<vmem>>, vector<16x32xf32>,
    return
  }
  func.func @transform_0(%arg0: i32, %arg1: memref<2xi32, #tpu.memory_space<smem>>) -> (i32, i32) {
    %c0_i32 = arith.constant 0 : i32
    %c0_i32_0 = arith.constant 0 : i32
    return %arg0, %c0_i32 : i32, i32
  }
  func.func @transform_1(%arg0: i32, %arg1: memref<2xi32, #tpu.memory_space<smem>>) -> (i32, i32, i32) {
    %0 = arith.index_cast %arg0 : i32 to index
    %1 = memref.load %arg1[%0] : memref<2xi32, #tpu.memory_space<smem>>
    %c0_i32 = arith.constant 0 : i32
    %c0_i32_0 = arith.constant 0 : i32
    %c0_i32_1 = arith.constant 0 : i32
    return %1, %c0_i32, %c0_i32_0 : i32, i32, i32
  }
  func.func @transform_2(%arg0: i32, %arg1: memref<2xi32, #tpu.memory_space<smem>>) -> (i32, i32) {
    %c0_i32 = arith.constant 0 : i32
    %c0_i32_0 = arith.constant 0 : i32
    %c0_i32_1 = arith.constant 0 : i32
    return %c0_i32, %c0_i32_0 : i32, i32
  }
  func.func @transform_3(%arg0: i32, %arg1: memref<2xi32, #tpu.memory_space<smem>>) -> (i32, i32) {
    %c0_i32 = arith.constant 0 : i32
    %c0_i32_0 = arith.constant 0 : i32
    return %arg0, %c0_i32 : i32, i32
  }
}

</mosaic_0001>

<bundles_post_ra>
// kernel: custom-call.16
= control target key start
LH: loop header
LB: loop body
LE: loop exit
PB: predicated region body
PF: predicated region fallthrough
CT: control target
= control target key end

     0   :  { %s6_s0 = inlined_call_operand.vmem [shape: u32[2], index: 0, kind: output, shape index: {}]  }

// kernel: align_pool_multi_avr.1
= control target key start
LH: loop header
LB: loop body
LE: loop exit
PB: predicated region body
PF: predicated region fallthrough
CT: control target
= control target key end

     0   :  { %s775_s0 = inlined_call_operand.vmem [shape: s32[2], index: 0, kind: input, shape index: {}]   ;;  %s776_s1 = inlined_call_operand.vmem [shape: bf16[32,320], index: 1, kind: input, shape index: {}]   ;;  %s777_s2 = inlined_call_operand.vmem [shape: bf16[2,320,32], index: 2, kind: input, shape index: {}]   ;;  %s778_s3 = inlined_call_operand.vmem [shape: f32[1,32], index: 3, kind: input, shape index: {}]   ;;  %s779_s4 = inlined_call_operand.vmem [shape: f32[32,32], index: 4, kind: output, shape index: {}]  }
   0x1   :  { %s9_s17 = sshll.u32 %s775_s0, 4  ;;  %s10_s17 = int_to_ptr.vmem [resolvable:$true] %s9_s17 }
   0x2   :  { %s668_s18 = scalar_lea.vmem %s10_s17, 16  ;;  %p673_p1 = scmp.lt.s32.totalorder %s10_s17, %s10_s17 }
   0x3   :  { %p669_p0 = scmp.ne.s32.totalorder %s10_s17, %s668_s18  ;;  %p674_p2 = scmp.lt.s32.totalorder %s668_s18, %s668_s18 }
   0x5   :  { %p675_p3 = por %p674_p2, %p673_p1 }
   0x7   :  { %p676_p4 = pnand %p675_p3, %p669_p0 }
   0x9   :  { %679 = shalt.err (!%p676_p4)  }
   0xa   :  { %s690_s19 = smov [#allocation3]  }
   0xb   :  { %12 = dma.vmem_to_smem %s10_s17, 16, %s690_s19, [#allocation2] }
   0xc   :  { %684 = dma.done.wait [#allocation2], 16 }
   0xd   :  { %685 = vsyncadd [#allocation2], 4294967280 }
   0xe   :  { %14 = sfence }
   0xf   :  { %s721_s20 = smov 0  }
  0x10 LB: > { %s555_s0 = sadd.s32 4294967295, %s688_s20   ;;  %p559_p5 = scmp.ge.s32.totalorder %s688_s20, 1  ;;  %s688_s20 = sphi %s721_s20, %s20_s20  }
  0x11   : > { %p160_p6 = scmp.lt.s32.totalorder %s688_s20, 3 }
  0x13   : > { %p161_p7 = pnand %p559_p5, %p160_p6 }
  0x14   : > { %s198_s21 = sld [smem:[#allocation3 + %s555_s0]] (!%p161_p7)  ;;  %s560_s22 = sshll.u32 (!%p161_p7), %s555_s0, 1  ;;  %v691_v0 = vmov (!%p161_p7), 0.0   ;;  %vm692_vm0 = vmmov (!%p161_p7), 0   ;;  %vm398_vm1 = vcmask (!%p161_p7), 523264   ;;  %vm484_vm2 = vcmask (!%p161_p7), 261120  }
  0x15   : > { %164 = sbr.rel (%p161_p7) target bundleno = 288 (0x120), region = 32  ;;  %619 = vmatprep.subr.bf16.mxu1 (!%p161_p7), %v691_v0  ;;  %p192_p8 = scmp.lt.s32.totalorder (!%p161_p7), %s560_s22, 3  ;;  %627 = vmatprep.mubr.msk.bf16.mxu1 (!%p161_p7), %vm692_vm0, %v691_v0  ;;  %v565_v30 = vld [vmem:[%s778_s3] ss:$0 sm:$0xff] (!%p161_p7) }
  0x1a   : > { %p199_p9 = scmp.lt.s32.totalorder (!%p161_p7), %s198_s21, 1 }
  0x1c   : > { %s781_s22 = smov (!%p192_p8, %s560_s22), 3  ;;  %s783_s21 = smov (!%p199_p9, %s198_s21), 1 }
  0x1d   : > { %s631_s23 = smul.u32 12, %s781_s22  ;;  %s564_s7 = sshll.u32 %s781_s22, 3 }
  0x1e   : > { %s632_s27 = smul.u32 160, %s783_s21  ;;  %s209_s10 = scalar_lea.vmem %s779_s4, %s564_s7 }
  0x1f   : > { %s735_s26 = scalar_lea.vmem %s776_s1, %s631_s23 }
  0x20   : > { %v665_v1 = vld [vmem:[%s735_s26 + $0x4] ss:$12 sps:$4 sm:$0xff]   ;;  %s741_s30 = scalar_lea.vmem %s777_s2, %s632_s27  ;;  %v667_v20 = vld [vmem:[%s735_s26 + $0x8] ss:$12 sps:$4 sm:$0xff]   ;;  %v663_v23 = vld [vmem:[%s735_s26] ss:$12 sps:$4 sm:$0xff]  }
  0x21   : > { %434 = vmatprep.mubr.bf16.mxu0 %v665_v1  ;;  %v644_v2 = vld [vmem:[%s741_s30 + $0x40] sm:$0xff]   ;;  %v646_v4 = vld [vmem:[%s741_s30 + $0x48] sm:$0xff]   ;;  %v648_v6 = vld [vmem:[%s741_s30 + $0x50] sm:$0xff]  }
  0x22   : > { %v645_v3 = vld [vmem:[%s741_s30] sm:$0xff]   ;;  %592 = vmatprep.subr.bf16.mxu0 %v644_v2  ;;  %v647_v5 = vld [vmem:[%s741_s30 + $0x8] sm:$0xff]   ;;  %v649_v7 = vld [vmem:[%s741_s30 + $0x10] sm:$0xff]  }
  0x23   : > { %593 = vmatpush3.bf16.msra.mxu0 %v645_v3  ;;  %v650_v8 = vld [vmem:[%s741_s30 + $0x58] sm:$0xff]   ;;  %v654_v9 = vld [vmem:[%s741_s30 + $0x80] sm:$0xff]   ;;  %v657_v12 = vld [vmem:[%s741_s30 + $0x88] sm:$0xff]  }
  0x24   : > { %594 = vmatprep.subr.bf16.mxu0 %v646_v4  ;;  %v651_v10 = vld [vmem:[%s741_s30 + $0x18] sm:$0xff]   ;;  %v652_v11 = vld [vmem:[%s741_s30 + $0x60] sm:$0xff]   ;;  %620 = vmatpush3.bf16.msra.mxu1 %v654_v9  ;;  %v655_v14 = vld [vmem:[%s741_s30 + $0x68] sm:$0xff]  }
  0x25   : > { %621 = vmatprep.subr.bf16.mxu1 %v691_v0  ;;  %v653_v13 = vld [vmem:[%s741_s30 + $0x20] sm:$0xff]   ;;  %v660_v15 = vld [vmem:[%s741_s30 + $0x90] sm:$0xff]   ;;  %v656_v16 = vld [vmem:[%s741_s30 + $0x28] sm:$0xff]  }
  0x26   : > { %v658_v17 = vld [vmem:[%s741_s30 + $0x70] sm:$0xff]   ;;  %v666_v18 = vld [vmem:[%s741_s30 + $0x98] sm:$0xff]  }
  0x27   : > { %595 = vmatpush3.bf16.msra.mxu0 %v647_v5  ;;  %v659_v19 = vld [vmem:[%s741_s30 + $0x30] sm:$0xff]   ;;  %v661_v21 = vld [vmem:[%s741_s30 + $0x78] sm:$0xff]  }
  0x28   : > { %596 = vmatprep.subr.bf16.mxu0 %v648_v6  ;;  %622 = vmatpush3.bf16.msra.mxu1 %v657_v12  ;;  %v662_v22 = vld [vmem:[%s741_s30 + $0x38] sm:$0xff]  }
  0x29   : > { %623 = vmatprep.subr.bf16.mxu1 %v691_v0 }
  0x2b   : > { %597 = vmatpush3.bf16.msra.mxu0 %v649_v7 }
  0x2c   : > { %598 = vmatprep.subr.bf16.mxu0 %v650_v8  ;;  %624 = vmatpush3.bf16.msra.mxu1 %v660_v15 }
  0x2d   : > { %625 = vmatprep.subr.bf16.mxu1 %v691_v0 }
  0x2f   : > { %599 = vmatpush3.bf16.msra.mxu0 %v651_v10 }
  0x30   : > { %600 = vmatprep.subr.bf16.mxu0 %v652_v11  ;;  %626 = vmatpush3.bf16.msra.mxu1 %v666_v18 }
  0x33   : > { %601 = vmatpush3.bf16.msra.mxu0 %v653_v13  ;;  %628 = vmatmul.mubr.msk.bf16.vlgmr.msra.gmra.mrb[0].mxu1 %vm398_vm1, %v667_v20 }
  0x34   : > { %602 = vmatprep.subr.bf16.mxu0 %v655_v14 }
  0x37   : > { %603 = vmatpush3.bf16.msra.mxu0 %v656_v16 }
  0x38   : > { %604 = vmatprep.subr.bf16.mxu0 %v658_v17 }
  0x3b   : > { %605 = vmatpush3.bf16.msra.mxu0 %v659_v19 }
  0x3c   : > { %606 = vmatprep.subr.bf16.mxu0 %v661_v21 }
  0x3f   : > { %607 = vmatpush3.bf16.msra.mxu0 %v662_v22 }
  0x42   : > { %435 = vmatmul.mubr.bf16.vlgmr.msra.gmra.mrb[0].mxu0 %v663_v23 }
 0x106   : > { %v477_v24 = vpop.f32.mrb[0].mxu1 }
 0x107   : > { %v629_v25 = vpop.f32.mrb[1].mxu1 }
 0x108   : > { %v480_v26 = vpop.f32.mrb[2].mxu1 }
 0x109   : > { %v630_v27 = vpop.f32.mrb[3].mxu1 }
 0x115   : > { %v608_v28 = vpop.f32.mrb[0].mxu0 }
 0x116   : > { %v609_v29 = vpop.f32.mrb[1].mxu0 }
 0x117   : > { %v610_v31 = vadd.f32 %v609_v29, %v608_v28  ;;  %v611_v32 = vpop.f32.mrb[2].mxu0 }
 0x118   : > { %v612_v33 = vpop.f32.mrb[3].mxu0 }
 0x119   : > { %v437_v34 = vadd.f32 %v610_v31, %v565_v30  ;;  %v613_v35 = vadd.f32 %v612_v33, %v611_v32 }
 0x11b   : > { %v478_v36 = vadd.f32 %v477_v24, %v437_v34  ;;  %v440_v37 = vadd.f32 %v613_v35, %v565_v30 }
 0x11d   : > { %485 = vst.msk [vmem:[%s209_s10] sm:$0xff] %vm484_vm2, %v478_v36  ;;  %v481_v38 = vadd.f32 %v480_v26, %v440_v37 }
 0x11f   : > { %486 = vst.msk [vmem:[%s209_s10 + $0x8] sm:$0xff] %vm484_vm2, %v481_v38 }
 0x120 PF: > { %s20_s20 = sadd.s32 1, %s688_s20  }
 0x121   : > { %p17_p10 = scmp.ge.s32.totalorder %s20_s20, 4  }
 0x123   :  { %19 = sbr.rel (!%p17_p10) target bundleno = 16 (0x10), region = 65 }

</bundles_post_ra>
